<compile_context>
chip_gen: v6e
topology: v6e:2x2x1
jax: 0.10.0
libtpu: 0.0.40
codegen_flags: <defaults>
</compile_context>

<pallas_src>
import jax
import jax.numpy as jnp
from jax import lax
from jax.experimental import pallas as pl
from jax.experimental.pallas import tpu as pltpu


# ---------------------------------------------------------------------------
# Fused kernel: n_layers of tanh-RNN + final Linear, all in VMEM.
# ---------------------------------------------------------------------------
def make_fused_rnn_linear_kernel(n_layers, seq, batch, hidden, in_dim):
    """Builds the fused kernel for static (n_layers, seq, batch, hidden, in_dim).

    Kernel ref order (inputs, then output):
      x                              (seq, batch, in_dim)
      [w_ih_t, w_hh_t, b] * n_layers (d, hidden), (hidden, hidden), (1, hidden)
      lin_w_t, lin_b                 (hidden, out), (1, out)
      out                            (batch, out)
    """

    def kernel(*refs):
        x_ref = refs[0]
        lyr_refs = refs[1:1 + 3 * n_layers]
        lin_w_t_ref = refs[1 + 3 * n_layers]
        lin_b_ref = refs[2 + 3 * n_layers]
        out_ref = refs[3 + 3 * n_layers]

        # Current layer input, flattened to (seq*batch, d) for one big matmul.
        cur = x_ref[...].reshape(seq * batch, in_dim)
        h_last = None

        for l in range(n_layers):
            w_ih_t_ref, w_hh_t_ref, b_ref = lyr_refs[3 * l:3 * l + 3]
            is_last = (l == n_layers - 1)

            # Hoisted input projection + fused bias: one MXU matmul with
            # M = seq*batch instead of seq tiny matmuls inside the recurrence.
            pre = (
                jnp.dot(cur, w_ih_t_ref[...],
                        preferred_element_type=jnp.float32)
                + b_ref[...]
            )  # (seq*batch, hidden)

            # Hoist the recurrent weight load out of the time loop.
            w_hh_t = w_hh_t_ref[...]  # (hidden, hidden)

            # Serial recurrence: only one matmul per step on the critical path.
            # seq is small & static -> fully unrolled (static slices, full
            # scheduler visibility).
            h = jnp.zeros((batch, hidden), jnp.float32)
            outs = []
            for t in range(seq):
                h = jnp.tanh(
                    pre[t * batch:(t + 1) * batch, :]
                    + jnp.dot(h, w_hh_t, preferred_element_type=jnp.float32)
                )
                if not is_last:
                    outs.append(h)  # needed as next layer's input

            if is_last:
                h_last = h  # last layer: per-step outputs are dead, keep h_n only
            else:
                cur = jnp.concatenate(outs, axis=0)  # (seq*batch, hidden)

        # Final Linear head on hid1[-1] (fused; single small store to HBM).
        out_ref[...] = (
            jnp.dot(h_last, lin_w_t_ref[...],
                    preferred_element_type=jnp.float32)
            + lin_b_ref[...]
        )

    return kernel


# ---------------------------------------------------------------------------
# Wrappers
# ---------------------------------------------------------------------------
def prepare_params(params):
    """One-time parameter prep: transposes + fused biases (hoisted out of forward)."""
    layers = []
    for (w_ih, w_hh, b_ih, b_hh) in params["rnn"]:
        layers.append((
            jnp.asarray(w_ih).T,                      # (d, hidden)
            jnp.asarray(w_hh).T,                      # (hidden, hidden)
            (b_ih + b_hh).reshape(1, -1),             # (1, hidden)
        ))
    return {
        "layers": tuple(layers),
        "lin_w_t": jnp.asarray(params["lin_w"]).T,    # (hidden, out)
        "lin_b": jnp.asarray(params["lin_b"]).reshape(1, -1),
    }


@jax.jit
def rnn_linear_forward(x, prepared):
    """out2 = linear(final hidden state of last RNN layer). Single pallas_call."""
    seq, batch, in_dim = x.shape
    layers = prepared["layers"]
    n_layers = len(layers)
    hidden = layers[0][0].shape[1]
    lin_w_t = prepared["lin_w_t"]
    out_dim = lin_w_t.shape[1]

    flat_inputs = [x]
    for (w_ih_t, w_hh_t, b) in layers:
        flat_inputs += [w_ih_t, w_hh_t, b]
    flat_inputs += [lin_w_t, prepared["lin_b"]]

    kernel = make_fused_rnn_linear_kernel(n_layers, seq, batch, hidden, in_dim)
    vmem = pl.BlockSpec(memory_space=pltpu.MemorySpace.VMEM)

    return pl.pallas_call(
        kernel,
        out_shape=jax.ShapeDtypeStruct((batch, out_dim), jnp.float32),
        in_specs=[vmem] * len(flat_inputs),
        out_specs=vmem,
    )(*flat_inputs)


# ---------------------------------------------------------------------------
# Pure-JAX reference (PyTorch eval-mode semantics) for correctness checking.
# ---------------------------------------------------------------------------
def rnn_linear_reference(x, params):
    hi = lax.Precision.HIGHEST
    layer_in = x
    for (w_ih, w_hh, b_ih, b_hh) in params["rnn"]:
        seq, batch, _ = layer_in.shape
        hidden = w_hh.shape[0]
        h = jnp.zeros((batch, hidden), jnp.float32)
        outs = []
        for t in range(seq):
            h = jnp.tanh(
                jnp.dot(layer_in[t], w_ih.T, precision=hi) + b_ih
                + jnp.dot(h, w_hh.T, precision=hi) + b_hh
            )
            outs.append(h)
        layer_in = jnp.stack(outs, axis=0)
    h_last = layer_in[-1]
    return jnp.dot(h_last, params["lin_w"].T, precision=hi) + params["lin_b"]


# ---------------------------------------------------------------------------
# Deterministic parameter init (PyTorch-style uniform(-1/sqrt(H), 1/sqrt(H)))
# ---------------------------------------------------------------------------
def init_params(key, input_size, hidden_size, output_size, n_layers):
    bound = 1.0 / jnp.sqrt(hidden_size)
    params = {"rnn": []}
    for l in range(n_layers):
        in_dim = input_size if l == 0 else hidden_size
        key, k1, k2, k3, k4 = jax.random.split(key, 5)
        w_ih = jax.random.uniform(k1, (hidden_size, in_dim), jnp.float32, -bound, bound)
        w_hh = jax.random.uniform(k2, (hidden_size, hidden_size), jnp.float32, -bound, bound)
        b_ih = jax.random.uniform(k3, (hidden_size,), jnp.float32, -bound, bound)
        b_hh = jax.random.uniform(k4, (hidden_size,), jnp.float32, -bound, bound)
        params["rnn"].append((w_ih, w_hh, b_ih, b_hh))
    key, k1, k2 = jax.random.split(key, 3)
    lb = 1.0 / jnp.sqrt(hidden_size)
    params["lin_w"] = jax.random.uniform(k1, (output_size, hidden_size), jnp.float32, -lb, lb)
    params["lin_b"] = jax.random.uniform(k2, (output_size,), jnp.float32, -lb, lb)
    return params


if __name__ == "__main__":
    # Small shapes consistent with the module's forward:
    seq_len, batch = 8, 2
    input_size, hidden_size, n_layers = 16, 32, 2

    key = jax.random.PRNGKey(0)
    key, kx = jax.random.split(key)
    x = jax.random.normal(kx, (seq_len, batch, input_size), jnp.float32)

    params = init_params(key, input_size, hidden_size, input_size, n_layers)
    prepared = prepare_params(params)

    out = rnn_linear_forward(x, prepared)
    out = jax.block_until_ready(out)
    assert out.shape == (batch, input_size), out.shape

    ref = rnn_linear_reference(x, params)
    max_diff = float(jnp.max(jnp.abs(out - ref)))
    assert jnp.allclose(out, ref, atol=5e-3, rtol=5e-3), max_diff

    print("KERNEL_OK")
</pallas_src>

<mosaic_0001>
module attributes {stable_mosaic.version = 11 : i64} {
  func.func @kernel(%arg0: memref<8x2x16xf32, #tpu.memory_space<vmem>>, %arg1: memref<16x32xf32, #tpu.memory_space<vmem>>, %arg2: memref<32x32xf32, #tpu.memory_space<vmem>>, %arg3: memref<1x32xf32, #tpu.memory_space<vmem>>, %arg4: memref<32x32xf32, #tpu.memory_space<vmem>>, %arg5: memref<32x32xf32, #tpu.memory_space<vmem>>, %arg6: memref<1x32xf32, #tpu.memory_space<vmem>>, %arg7: memref<32x16xf32, #tpu.memory_space<vmem>>, %arg8: memref<1x16xf32, #tpu.memory_space<vmem>>, %arg9: memref<2x16xf32, #tpu.memory_space<vmem>>) attributes {dimension_semantics = [], scalar_prefetch = 0 : i64, scratch_operands = 0 : i64, tpu.core_type = #tpu.core_type<tc>} {
    %c0 = arith.constant 0 : index
    %c0_0 = arith.constant 0 : index
    %c0_1 = arith.constant 0 : index
    %0 = vector.load %arg0[%c0, %c0_0, %c0_1] : memref<8x2x16xf32, #tpu.memory_space<vmem>>, vector<8x2x16xf32>
    %1 = vector.shape_cast %0 : vector<8x2x16xf32> to vector<16x16xf32>
    %c0_2 = arith.constant 0 : index
    %c0_3 = arith.constant 0 : index
    %2 = vector.load %arg1[%c0_2, %c0_3] : memref<16x32xf32, #tpu.memory_space<vmem>>, vector<16x32xf32>
    %cst = arith.constant dense<0.000000e+00> : vector<16x32xf32>
    %3 = tpu.matmul %1, %2, %cst {dimension_numbers = #tpu.dot_dimension_numbers<[1], [0], [0], [1], [0, 0, 1, 1], [], []>} : vector<16x16xf32>, vector<16x32xf32>, vector<16x32xf32> -> vector<16x32xf32>
    %c0_4 = arith.constant 0 : index
    %c0_5 = arith.constant 0 : index
    %4 = vector.load %arg3[%c0_4, %c0_5] : memref<1x32xf32, #tpu.memory_space<vmem>>, vector<1x32xf32>
    %5 = vector.broadcast %4 : vector<1x32xf32> to vector<16x32xf32>
    %6 = arith.addf %3, %5 : vector<16x32xf32>
    %c0_6 = arith.constant 0 : index
    %c0_7 = arith.constant 0 : index
    %7 = vector.load %arg2[%c0_6, %c0_7] : memref<32x32xf32, #tpu.memory_space<vmem>>, vector<32x32xf32>
    %cst_8 = arith.constant 0.000000e+00 : f32
    %8 = vector.broadcast %cst_8 : f32 to vector<2x32xf32>
    %9 = vector.extract_strided_slice %6 {offsets = [0, 0], sizes = [2, 32], strides = [1, 1]} : vector<16x32xf32> to vector<2x32xf32>
    %cst_9 = arith.constant dense<0.000000e+00> : vector<2x32xf32>
    %10 = tpu.matmul %8, %7, %cst_9 {dimension_numbers = #tpu.dot_dimension_numbers<[1], [0], [0], [1], [0, 0, 1, 1], [], []>} : vector<2x32xf32>, vector<32x32xf32>, vector<2x32xf32> -> vector<2x32xf32>
    %11 = arith.addf %9, %10 : vector<2x32xf32>
    %12 = math.tanh %11 : vector<2x32xf32>
    %13 = vector.extract_strided_slice %6 {offsets = [2, 0], sizes = [2, 32], strides = [1, 1]} : vector<16x32xf32> to vector<2x32xf32>
    %cst_10 = arith.constant dense<0.000000e+00> : vector<2x32xf32>
    %14 = tpu.matmul %12, %7, %cst_10 {dimension_numbers = #tpu.dot_dimension_numbers<[1], [0], [0], [1], [0, 0, 1, 1], [], []>} : vector<2x32xf32>, vector<32x32xf32>, vector<2x32xf32> -> vector<2x32xf32>
    %15 = arith.addf %13, %14 : vector<2x32xf32>
    %16 = math.tanh %15 : vector<2x32xf32>
    %17 = vector.extract_strided_slice %6 {offsets = [4, 0], sizes = [2, 32], strides = [1, 1]} : vector<16x32xf32> to vector<2x32xf32>
    %cst_11 = arith.constant dense<0.000000e+00> : vector<2x32xf32>
    %18 = tpu.matmul %16, %7, %cst_11 {dimension_numbers = #tpu.dot_dimension_numbers<[1], [0], [0], [1], [0, 0, 1, 1], [], []>} : vector<2x32xf32>, vector<32x32xf32>, vector<2x32xf32> -> vector<2x32xf32>
    %19 = arith.addf %17, %18 : vector<2x32xf32>
    %20 = math.tanh %19 : vector<2x32xf32>
    %21 = vector.extract_strided_slice %6 {offsets = [6, 0], sizes = [2, 32], strides = [1, 1]} : vector<16x32xf32> to vector<2x32xf32>
    %cst_12 = arith.constant dense<0.000000e+00> : vector<2x32xf32>
    %22 = tpu.matmul %20, %7, %cst_12 {dimension_numbers = #tpu.dot_dimension_numbers<[1], [0], [0], [1], [0, 0, 1, 1], [], []>} : vector<2x32xf32>, vector<32x32xf32>, vector<2x32xf32> -> vector<2x32xf32>
    %23 = arith.addf %21, %22 : vector<2x32xf32>
    %24 = math.tanh %23 : vector<2x32xf32>
    %25 = vector.extract_strided_slice %6 {offsets = [8, 0], sizes = [2, 32], strides = [1, 1]} : vector<16x32xf32> to vector<2x32xf32>
    %cst_13 = arith.constant dense<0.000000e+00> : vector<2x32xf32>
    %26 = tpu.matmul %24, %7, %cst_13 {dimension_numbers = #tpu.dot_dimension_numbers<[1], [0], [0], [1], [0, 0, 1, 1], [], []>} : vector<2x32xf32>, vector<32x32xf32>, vector<2x32xf32> -> vector<2x32xf32>
    %27 = arith.addf %25, %26 : vector<2x32xf32>
    %28 = math.tanh %27 : vector<2x32xf32>
    %29 = vector.extract_strided_slice %6 {offsets = [10, 0], sizes = [2, 32], strides = [1, 1]} : vector<16x32xf32> to vector<2x32xf32>
    %cst_14 = arith.constant dense<0.000000e+00> : vector<2x32xf32>
    %30 = tpu.matmul %28, %7, %cst_14 {dimension_numbers = #tpu.dot_dimension_numbers<[1], [0], [0], [1], [0, 0, 1, 1], [], []>} : vector<2x32xf32>, vector<32x32xf32>, vector<2x32xf32> -> vector<2x32xf32>
    %31 = arith.addf %29, %30 : vector<2x32xf32>
    %32 = math.tanh %31 : vector<2x32xf32>
    %33 = vector.extract_strided_slice %6 {offsets = [12, 0], sizes = [2, 32], strides = [1, 1]} : vector<16x32xf32> to vector<2x32xf32>
    %cst_15 = arith.constant dense<0.000000e+00> : vector<2x32xf32>
    %34 = tpu.matmul %32, %7, %cst_15 {dimension_numbers = #tpu.dot_dimension_numbers<[1], [0], [0], [1], [0, 0, 1, 1], [], []>} : vector<2x32xf32>, vector<32x32xf32>, vector<2x32xf32> -> vector<2x32xf32>
    %35 = arith.addf %33, %34 : vector<2x32xf32>
    %36 = math.tanh %35 : vector<2x32xf32>
    %37 = vector.extract_strided_slice %6 {offsets = [14, 0], sizes = [2, 32], strides = [1, 1]} : vector<16x32xf32> to vector<2x32xf32>
    %cst_16 = arith.constant dense<0.000000e+00> : vector<2x32xf32>
    %38 = tpu.matmul %36, %7, %cst_16 {dimension_numbers = #tpu.dot_dimension_numbers<[1], [0], [0], [1], [0, 0, 1, 1], [], []>} : vector<2x32xf32>, vector<32x32xf32>, vector<2x32xf32> -> vector<2x32xf32>
    %39 = arith.addf %37, %38 : vector<2x32xf32>
    %40 = math.tanh %39 : vector<2x32xf32>
    %41 = tpu.concatenate %12, %16, %20, %24, %28, %32, %36, %40 in 0 : vector<2x32xf32>, vector<2x32xf32>, vector<2x32xf32>, vector<2x32xf32>, vector<2x32xf32>, vector<2x32xf32>, vector<2x32xf32>, vector<2x32xf32> -> vector<16x32xf32>
    %c0_17 = arith.constant 0 : index
    %c0_18 = arith.constant 0 : index
    %42 = vector.load %arg4[%c0_17, %c0_18] : memref<32x32xf32, #tpu.memory_space<vmem>>, vector<32x32xf32>
    %cst_19 = arith.constant dense<0.000000e+00> : vector<16x32xf32>
    %43 = tpu.matmul %41, %42, %cst_19 {dimension_numbers = #tpu.dot_dimension_numbers<[1], [0], [0], [1], [0, 0, 1, 1], [], []>} : vector<16x32xf32>, vector<32x32xf32>, vector<16x32xf32> -> vector<16x32xf32>
    %c0_20 = arith.constant 0 : index
    %c0_21 = arith.constant 0 : index
    %44 = vector.load %arg6[%c0_20, %c0_21] : memref<1x32xf32, #tpu.memory_space<vmem>>, vector<1x32xf32>
    %45 = vector.broadcast %44 : vector<1x32xf32> to vector<16x32xf32>
    %46 = arith.addf %43, %45 : vector<16x32xf32>
    %c0_22 = arith.constant 0 : index
    %c0_23 = arith.constant 0 : index
    %47 = vector.load %arg5[%c0_22, %c0_23] : memref<32x32xf32, #tpu.memory_space<vmem>>, vector<32x32xf32>
    %cst_24 = arith.constant 0.000000e+00 : f32
    %48 = vector.broadcast %cst_24 : f32 to vector<2x32xf32>
    %49 = vector.extract_strided_slice %46 {offsets = [0, 0], sizes = [2, 32], strides = [1, 1]} : vector<16x32xf32> to vector<2x32xf32>
    %cst_25 = arith.constant dense<0.000000e+00> : vector<2x32xf32>
    %50 = tpu.matmul %48, %47, %cst_25 {dimension_numbers = #tpu.dot_dimension_numbers<[1], [0], [0], [1], [0, 0, 1, 1], [], []>} : vector<2x32xf32>, vector<32x32xf32>, vector<2x32xf32> -> vector<2x32xf32>
    %51 = arith.addf %49, %50 : vector<2x32xf32>
    %52 = math.tanh %51 : vector<2x32xf32>
    %53 = vector.extract_strided_slice %46 {offsets = [2, 0], sizes = [2, 32], strides = [1, 1]} : vector<16x32xf32> to vector<2x32xf32>
    %cst_26 = arith.constant dense<0.000000e+00> : vector<2x32xf32>
    %54 = tpu.matmul %52, %47, %cst_26 {dimension_numbers = #tpu.dot_dimension_numbers<[1], [0], [0], [1], [0, 0, 1, 1], [], []>} : vector<2x32xf32>, vector<32x32xf32>, vector<2x32xf32> -> vector<2x32xf32>
    %55 = arith.addf %53, %54 : vector<2x32xf32>
    %56 = math.tanh %55 : vector<2x32xf32>
    %57 = vector.extract_strided_slice %46 {offsets = [4, 0], sizes = [2, 32], strides = [1, 1]} : vector<16x32xf32> to vector<2x32xf32>
    %cst_27 = arith.constant dense<0.000000e+00> : vector<2x32xf32>
    %58 = tpu.matmul %56, %47, %cst_27 {dimension_numbers = #tpu.dot_dimension_numbers<[1], [0], [0], [1], [0, 0, 1, 1], [], []>} : vector<2x32xf32>, vector<32x32xf32>, vector<2x32xf32> -> vector<2x32xf32>
    %59 = arith.addf %57, %58 : vector<2x32xf32>
    %60 = math.tanh %59 : vector<2x32xf32>
    %61 = vector.extract_strided_slice %46 {offsets = [6, 0], sizes = [2, 32], strides = [1, 1]} : vector<16x32xf32> to vector<2x32xf32>
    %cst_28 = arith.constant dense<0.000000e+00> : vector<2x32xf32>
    %62 = tpu.matmul %60, %47, %cst_28 {dimension_numbers = #tpu.dot_dimension_numbers<[1], [0], [0], [1], [0, 0, 1, 1], [], []>} : vector<2x32xf32>, vector<32x32xf32>, vector<2x32xf32> -> vector<2x32xf32>
    %63 = arith.addf %61, %62 : vector<2x32xf32>
    %64 = math.tanh %63 : vector<2x32xf32>
    %65 = vector.extract_strided_slice %46 {offsets = [8, 0], sizes = [2, 32], strides = [1, 1]} : vector<16x32xf32> to vector<2x32xf32>
    %cst_29 = arith.constant dense<0.000000e+00> : vector<2x32xf32>
    %66 = tpu.matmul %64, %47, %cst_29 {dimension_numbers = #tpu.dot_dimension_numbers<[1], [0], [0], [1], [0, 0, 1, 1], [], []>} : vector<2x32xf32>, vector<32x32xf32>, vector<2x32xf32> -> vector<2x32xf32>
    %67 = arith.addf %65, %66 : vector<2x32xf32>
    %68 = math.tanh %67 : vector<2x32xf32>
    %69 = vector.extract_strided_slice %46 {offsets = [10, 0], sizes = [2, 32], strides = [1, 1]} : vector<16x32xf32> to vector<2x32xf32>
    %cst_30 = arith.constant dense<0.000000e+00> : vector<2x32xf32>
    %70 = tpu.matmul %68, %47, %cst_30 {dimension_numbers = #tpu.dot_dimension_numbers<[1], [0], [0], [1], [0, 0, 1, 1], [], []>} : vector<2x32xf32>, vector<32x32xf32>, vector<2x32xf32> -> vector<2x32xf32>
    %71 = arith.addf %69, %70 : vector<2x32xf32>
    %72 = math.tanh %71 : vector<2x32xf32>
    %73 = vector.extract_strided_slice %46 {offsets = [12, 0], sizes = [2, 32], strides = [1, 1]} : vector<16x32xf32> to vector<2x32xf32>
    %cst_31 = arith.constant dense<0.000000e+00> : vector<2x32xf32>
    %74 = tpu.matmul %72, %47, %cst_31 {dimension_numbers = #tpu.dot_dimension_numbers<[1], [0], [0], [1], [0, 0, 1, 1], [], []>} : vector<2x32xf32>, vector<32x32xf32>, vector<2x32xf32> -> vector<2x32xf32>
    %75 = arith.addf %73, %74 : vector<2x32xf32>
    %76 = math.tanh %75 : vector<2x32xf32>
    %77 = vector.extract_strided_slice %46 {offsets = [14, 0], sizes = [2, 32], strides = [1, 1]} : vector<16x32xf32> to vector<2x32xf32>
    %cst_32 = arith.constant dense<0.000000e+00> : vector<2x32xf32>
    %78 = tpu.matmul %76, %47, %cst_32 {dimension_numbers = #tpu.dot_dimension_numbers<[1], [0], [0], [1], [0, 0, 1, 1], [], []>} : vector<2x32xf32>, vector<32x32xf32>, vector<2x32xf32> -> vector<2x32xf32>
    %79 = arith.addf %77, %78 : vector<2x32xf32>
    %80 = math.tanh %79 : vector<2x32xf32>
    %c0_33 = arith.constant 0 : index
    %c0_34 = arith.constant 0 : index
    %81 = vector.load %arg7[%c0_33, %c0_34] : memref<32x16xf32, #tpu.memory_space<vmem>>, vector<32x16xf32>
    %cst_35 = arith.constant dense<0.000000e+00> : vector<2x16xf32>
    %82 = tpu.matmul %80, %81, %cst_35 {dimension_numbers = #tpu.dot_dimension_numbers<[1], [0], [0], [1], [0, 0, 1, 1], [], []>} : vector<2x32xf32>, vector<32x16xf32>, vector<2x16xf32> -> vector<2x16xf32>
    %c0_36 = arith.constant 0 : index
    %c0_37 = arith.constant 0 : index
    %83 = vector.load %arg8[%c0_36, %c0_37] : memref<1x16xf32, #tpu.memory_space<vmem>>, vector<1x16xf32>
    %84 = vector.broadcast %83 : vector<1x16xf32> to vector<2x16xf32>
    %85 = arith.addf %82, %84 : vector<2x16xf32>
    %c0_38 = arith.constant 0 : index
    %c0_39 = arith.constant 0 : index
    %86 = vector.load %arg9[%c0_38, %c0_39] : memref<2x16xf32, #tpu.memory_space<vmem>>, vector<2x16xf32>
    tpu.vector_store %arg9[%c0_38, %c0_39], %85 {strides = array<i32>} : memref<2x16xf32, #tpu.memory_space<vmem>>, vector<2x16xf32>,
    return
  }
}

</mosaic_0001>

<bundles_post_ra>
// kernel: rnn_linear_forward.1
= control target key start
LH: loop header
LB: loop body
LE: loop exit
PB: predicated region body
PF: predicated region fallthrough
CT: control target
= control target key end

     0   :  { %14 = vsyncpa [#allocation3], 0  ;;  %s2465_s0 = inlined_call_operand.vmem [shape: f32[8,2,16], index: 0, kind: input, shape index: {}]   ;;  %s2466_s1 = inlined_call_operand.hbm [shape: f32[16,32], index: 1, kind: input, shape index: {}]   ;;  %s2467_s2 = inlined_call_operand.vmem [shape: f32[32,32], index: 2, kind: input, shape index: {}]   ;;  %s2468_s3 = inlined_call_operand.vmem [shape: f32[1,32], index: 3, kind: input, shape index: {}]   ;;  %s2469_s4 = inlined_call_operand.hbm [shape: f32[32,32], index: 4, kind: input, shape index: {}]   ;;  %s2470_s5 = inlined_call_operand.hbm [shape: f32[32,32], index: 5, kind: input, shape index: {}]   ;;  %s2471_s6 = inlined_call_operand.vmem [shape: f32[1,32], index: 6, kind: input, shape index: {}]   ;;  %s2472_s7 = inlined_call_operand.vmem [shape: f32[32,16], index: 7, kind: input, shape index: {}]   ;;  %s2473_s8 = inlined_call_operand.vmem [shape: f32[1,16], index: 8, kind: input, shape index: {}]   ;;  %s2474_s9 = inlined_call_operand.hbm [shape: f32[2,16], index: 9, kind: output, shape index: {}]  }
   0x1   :  { %15 = vsyncpa [#allocation6], 0 }
   0x2   :  { %16 = vsyncpa [#allocation4], 0  ;;  %s2118_s30 = smov [#allocation5]   ;;  %s2119_s11 = smov [#allocation2]  }
   0x3   :  { %s40_s10 = sshll.u32 %s2118_s30, 4  ;;  %s24_s12 = sshll.u32 %s2119_s11, 4  ;;  %s41_s10 = int_to_ptr.vmem [resolvable:$true] %s40_s10  ;;  %s25_s12 = int_to_ptr.vmem [resolvable:$true] %s24_s12 }
   0x4   :  { %s2040_s13 = scalar_lea.vmem %s41_s10, 512  ;;  %p2045_p1 = scmp.lt.s32.totalorder %s41_s10, %s41_s10 }
   0x5   :  { %p2041_p0 = scmp.ne.s32.totalorder %s41_s10, %s2040_s13  ;;  %p2046_p2 = scmp.lt.s32.totalorder %s2040_s13, %s2040_s13 }
   0x7   :  { %p2047_p3 = por %p2046_p2, %p2045_p1 }
   0x9   :  { %p2048_p4 = pnand %p2047_p3, %p2041_p0 }
   0xb   :  { %2051 = shalt.err (!%p2048_p4)
}
   0xc   :  { %s2120_s14 = smov 128   ;;  %s2121_s15 = smov 8  }
   0xd   :  { %46 = dma.hbm_to_vmem [thread:$0]  %s2469_s4, 512, %s41_s10, [#allocation6], %s2120_s14, %s2120_s14, %s2121_s15  }
   0xe   :  { %s2060_s18 = scalar_lea.vmem %s25_s12, 256  ;;  %p2065_p6 = scmp.lt.s32.totalorder %s25_s12, %s25_s12 }
   0xf   :  { %p2061_p5 = scmp.ne.s32.totalorder %s25_s12, %s2060_s18  ;;  %p2066_p7 = scmp.lt.s32.totalorder %s2060_s18, %s2060_s18 }
  0x11   :  { %p2067_p8 = por %p2066_p7, %p2065_p6 }
  0x13   :  { %p2068_p9 = pnand %p2067_p8, %p2061_p5 }
  0x15   :  { %2071 = shalt.err (!%p2068_p9)
}
  0x16   :  { %30 = dma.hbm_to_vmem [thread:$0]  %s2466_s1, 256, %s25_s12, [#allocation3], %s2120_s14, %s2120_s14, %s2121_s15  }
  0x17   :  { %s2122_s21 = smov [#allocation7]  }
  0x18   :  { %s52_s22 = sshll.u32 %s2122_s21, 4  ;;  %s53_s22 = int_to_ptr.vmem [resolvable:$true] %s52_s22 }
  0x19   :  { %s2080_s23 = scalar_lea.vmem %s53_s22, 512  ;;  %p2085_p11 = scmp.lt.s32.totalorder %s53_s22, %s53_s22 }
  0x1a   :  { %p2081_p10 = scmp.ne.s32.totalorder %s53_s22, %s2080_s23  ;;  %p2086_p12 = scmp.lt.s32.totalorder %s2080_s23, %s2080_s23 }
  0x1c   :  { %p2087_p13 = por %p2086_p12, %p2085_p11 }
  0x1e   :  { %p2088_p0 = pnand %p2087_p13, %p2081_p10 }
  0x20   :  { %2091 = shalt.err (!%p2088_p0)
}
  0x21   :  { %58 = dma.hbm_to_vmem [thread:$0]  %s2470_s5, 512, %s53_s22, [#allocation6], %s2120_s14, %s2120_s14, %s2121_s15  }
  0x22   :  { %2112 = dma.done.wait [#allocation3], 256  }
  0x23   :  { %2113 = vsyncadd [#allocation3], 4294967040 }
  0x24   :  { %2114 = dma.done.wait [#allocation6], 1024  }
  0x25   :  { %2115 = vsyncadd [#allocation6], 4294966272  ;;  %v104_v0 = vlaneseq  ;;  %v2123_v1 = vmov 0.0   ;;  %v2124_v2 = vmov 1983009808   ;;  %vm2125_vm0 = vmmov 0  }
  0x26   :  { %1793 = vmatprep.subr.mxu1 %v2123_v1  ;;  %v102_v3 = vunpack.c.l.s4 %v2124_v2  ;;  %1801 = vmatprep.mubr.msk.f32.mxu1 %vm2125_vm0, %v2123_v1  ;;  %v2192_v6 = vld [vmem:[%s2467_s2 + $0x18] sm:$0xff]  ;;  %v83_v7 = vld [vmem:[#allocation2 + $0x8] sm:$0xff]  ;;  %v2197_v8 = vld [vmem:[%s2467_s2 + $0x10] sm:$0xff]  ;;  %vm133_vm1 = vcmask 130048   ;;  %vm217_vm2 = vcmask 261120   ;;  %vm841_vm3 = vcmask 1041408  }
  0x27   :  { %v105_v5 = vshrl.u32 %v104_v0, 7  ;;  %1794 = vmatpush3.msra.mxu1 %v2192_v6  ;;  %1786 = vmatprep.subr.mxu0 %v83_v7  ;;  %v82_v10 = vld [vmem:[#allocation2] sm:$0xff]  ;;  %v2216_v16 = vld [vmem:[%s2467_s2 + $0x8] sm:$0xff]  ;;  %vm843_vm4 = vcmask 1043456   ;;  %vm845_vm5 = vcmask 1045504   ;;  %s2126_s12 = smov [#allocation8]  }
  0x28   :  { %v103_v4 = vunpack.c.0.s8 %v102_v3  ;;  %v74_v11 = vld [vmem:[%s2465_s0] sm:$0x3]  ;;  %v75_v12 = vld [vmem:[%s2465_s0 + $0x2] sm:$0x3]  ;;  %1795 = vmatprep.subr.mxu1 %v2123_v1  ;;  %1787 = vmatpush3.msra.mxu0 %v83_v7  ;;  %v76_v13 = vld [vmem:[%s2465_s0 + $0x4] sm:$0x3] }
  0x29   :  { %v77_v14 = vld [vmem:[%s2465_s0 + $0x6] sm:$0x3]  ;;  %v99_v15 = vcombine.low %v74_v11, %v75_v12  ;;  %1796 = vmatpush3.msra.mxu1 %v2197_v8  ;;  %1788 = vmatprep.subr.mxu0 %v82_v10  ;;  %v78_v18 = vld [vmem:[%s2465_s0 + $0x8] sm:$0x3]  ;;  %v79_v19 = vld [vmem:[%s2465_s0 + $0xa] sm:$0x3] }
  0x2a   :  { %v106_v9 = vsub.s32 %v103_v4, %v105_v5  ;;  %v100_v17 = vcombine.low %v76_v13, %v77_v14  ;;  %v80_v20 = vld [vmem:[%s2465_s0 + $0xc] sm:$0x3]  ;;  %1797 = vmatprep.subr.mxu1 %v2123_v1  ;;  %1789 = vmatpush3.msra.mxu0 %v82_v10  ;;  %v81_v22 = vld [vmem:[%s2465_s0 + $0xe] sm:$0x3]  ;;  %v116_v23 = vcombine.low %v78_v18, %v79_v19  ;;  %v2235_v24 = vld [vmem:[%s2467_s2] sm:$0xff]  ;;  %s1659_s13 = sshll.u32 %s2126_s12, 4  ;;  %s1660_s13 = int_to_ptr.vmem [resolvable:$true] %s1659_s13 }
  0x2b   :  { %1798 = vmatpush3.msra.mxu1 %v2216_v16  ;;  %v117_v26 = vcombine.low %v80_v20, %v81_v22  ;;  %1804 = vmatprep.subr.mxu0 %v2123_v1  ;;  %v1669_v32 = vld [vmem:[%s2468_s3] ss:$0 sm:$0xff]  ;;  %v2335_v18 = vld [vmem:[#allocation7 + $0x18] sm:$0xff]  ;;  %v851_v20 = vld [vmem:[#allocation5 + $0x8] sm:$0xff]  ;;  %vm1651_vm6 = vcmask 123904   ;;  %p2097_p2 = scmp.lt.s32.totalorder %s1660_s13, %s1660_s13 }
  0x2c   :  { %v107_v21 = vrot.slane %v99_v15, %v106_v9  ;;  %v114_v25 = vrot.slane %v100_v17, %v106_v9  ;;  %v124_v27 = vrot.slane %v116_v23, %v106_v9  ;;  %1799 = vmatprep.subr.mxu1 %v2123_v1  ;;  %v852_v17 = vld [vmem:[#allocation5 + $0x10] sm:$0xff]  ;;  %v850_v22 = vld [vmem:[#allocation5] sm:$0xff] }
  0x2d   :  { %v131_v29 = vrot.slane %v117_v26, %v106_v9  ;;  %1800 = vmatpush3.msra.mxu1 %v2235_v24  ;;  %v2338_v19 = vld [vmem:[#allocation7 + $0x10] sm:$0xff]  ;;  %v2348_v23 = vld [vmem:[#allocation7] sm:$0xff] }
  0x2e   :  { %v115_v28 = vcombine.low %v107_v21, %v114_v25  ;;  %1802 = vmatmul.mubr.f32.vlgmr.msra.gmra.mxu1 %v2123_v1  ;;  %1815 = vmatprep.subr.mxu1 %v2123_v1  ;;  %v2341_v21 = vld [vmem:[#allocation7 + $0x8] sm:$0xff] }
  0x2f   :  { %v132_v30 = vcombine.low %v124_v27, %v131_v29  ;;  %1816 = vmatpush3.msra.mxu1 %v2192_v6  ;;  %1823 = vmatprep.mubr.msk.f32.mxu1 %vm2125_vm0, %v2123_v1 }
  0x30   :  { %1790 = vmatprep.mubr.msk.f32.mxu0 %vm133_vm1, %v115_v28  ;;  %1817 = vmatprep.subr.mxu1 %v2123_v1 }
  0x31   :  { %1791 = vmatmul.mubr.msk.f32.vlgmr.msra.gmra.mxu0 %vm133_vm1, %v132_v30  ;;  %1818 = vmatpush3.msra.mxu1 %v2197_v8 }
  0x32   :  { %1805 = vmatpush3.msra.mxu0 %v2192_v6  ;;  %1812 = vmatprep.mubr.msk.f32.mxu0 %vm2125_vm0, %v2123_v1 }
  0x33   :  { %1806 = vmatprep.subr.mxu0 %v2123_v1  ;;  %1819 = vmatprep.subr.mxu1 %v2123_v1 }
  0x34   :  { %1807 = vmatpush3.msra.mxu0 %v2197_v8  ;;  %1820 = vmatpush3.msra.mxu1 %v2216_v16 }
  0x35   :  { %1808 = vmatprep.subr.mxu0 %v2123_v1  ;;  %1821 = vmatprep.subr.mxu1 %v2123_v1 }
  0x36   :  { %1809 = vmatpush3.msra.mxu0 %v2216_v16  ;;  %1822 = vmatpush3.msra.mxu1 %v2235_v24 }
  0x37   :  { %1810 = vmatprep.subr.mxu0 %v2123_v1  ;;  %1837 = vmatprep.subr.mxu1 %v2123_v1 }
  0x38   :  { %1811 = vmatpush3.msra.mxu0 %v2235_v24 }
  0x39   :  { %1826 = vmatprep.subr.mxu0 %v2123_v1 }
  0xee   :  { %v287_v31 = vpop.f32.mrf.mxu1 }
  0xf0   :  { %v1803_v33 = vpop.f32.mrf.mxu1 }
  0xf1   :  { %v1792_v34 = vpop.f32.mrf.mxu0 }
  0xf2   :  { %v2266_v35 = vadd.f32 %v1792_v34, %v1669_v32 }
  0xf3   :  { %v204_v36 = vpop.f32.mrf.mxu0 }
  0xf4   :  { %v205_v37 = vadd.f32 %v1669_v32, %v204_v36  ;;  %v1679_v32 = vld [vmem:[%s2471_s6] ss:$0 sm:$0xff] }
  0xf6   :  { %v291_v38 = vadd.f32 %v287_v31, %v205_v37 }
  0xf8   :  { %2000 = vtanh.f32 %v291_v38 }
 0x105   :  { %v2001_v39 = vpop.eup %2000 }
 0x106   :  { %1813 = vmatmul.mubr.msk.f32.vlgmr.msra.gmra.mxu0 %vm217_vm2, %v2001_v39 }
 0x107   :  { %1827 = vmatpush3.msra.mxu0 %v2192_v6  ;;  %1834 = vmatprep.mubr.msk.f32.mxu0 %vm2125_vm0, %v2123_v1 }
 0x108   :  { %1828 = vmatprep.subr.mxu0 %v2123_v1 }
 0x109   :  { %1829 = vmatpush3.msra.mxu0 %v2197_v8 }
 0x10a   :  { %1830 = vmatprep.subr.mxu0 %v2123_v1 }
 0x10b   :  { %1831 = vmatpush3.msra.mxu0 %v2216_v16 }
 0x10c   :  { %1832 = vmatprep.subr.mxu0 %v2123_v1 }
 0x10d   :  { %1833 = vmatpush3.msra.mxu0 %v2235_v24 }
 0x10e   :  { %1848 = vmatprep.subr.mxu0 %v2123_v1 }
 0x1c6   :  { %v362_v40 = vpop.f32.mrf.mxu0 }
 0x1c7   :  { %v367_v41 = vrot.slane %v362_v40, 6 }
 0x1c8   :  { %v1814_v42 = vpop.f32.mrf.mxu0 }
 0x1c9   :  { %v369_v43 = vadd.f32 %v367_v41, %v205_v37 }
 0x1cb   :  { %2002 = vtanh.f32 %v369_v43 }
 0x1d8   :  { %v2003_v44 = vpop.eup %2002 }
 0x1d9   :  { %v372_v45 = vrot.slane %v2003_v44, 2  ;;  %v842_v51 = vsel %vm841_vm3, %v2001_v39, %v2003_v44 }
 0x1db   :  { %1824 = vmatmul.mubr.msk.f32.vlgmr.msra.gmra.mxu1 %vm217_vm2, %v372_v45 }
 0x1dc   :  { %1838 = vmatpush3.msra.mxu1 %v2192_v6  ;;  %1845 = vmatprep.mubr.msk.f32.mxu1 %vm2125_vm0, %v2123_v1 }
 0x1dd   :  { %1839 = vmatprep.subr.mxu1 %v2123_v1 }
 0x1de   :  { %1840 = vmatpush3.msra.mxu1 %v2197_v8 }
 0x1df   :  { %1841 = vmatprep.subr.mxu1 %v2123_v1 }
 0x1e0   :  { %1842 = vmatpush3.msra.mxu1 %v2216_v16 }
 0x1e1   :  { %1843 = vmatprep.subr.mxu1 %v2123_v1 }
 0x1e2   :  { %1844 = vmatpush3.msra.mxu1 %v2235_v24 }
 0x1e3   :  { %1859 = vmatprep.subr.mxu1 %v2123_v1 }
 0x29b   :  { %v441_v46 = vpop.f32.mrf.mxu1 }
 0x29c   :  { %v446_v47 = vrot.slane %v441_v46, 4 }
 0x29d   :  { %v1825_v48 = vpop.f32.mrf.mxu1 }
 0x29e   :  { %v448_v49 = vadd.f32 %v446_v47, %v205_v37 }
 0x2a0   :  { %2004 = vtanh.f32 %v448_v49 }
 0x2ad   :  { %v2005_v50 = vpop.eup %2004 }
 0x2ae   :  { %v451_v52 = vrot.slane %v2005_v50, 4  ;;  %v844_v53 = vsel %vm843_vm4, %v842_v51, %v2005_v50 }
 0x2b0   :  { %1835 = vmatmul.mubr.msk.f32.vlgmr.msra.gmra.mxu0 %vm217_vm2, %v451_v52 }
 0x2b1   :  { %1849 = vmatpush3.msra.mxu0 %v2192_v6  ;;  %1856 = vmatprep.mubr.msk.f32.mxu0 %vm2125_vm0, %v2123_v1 }
 0x2b2   :  { %1850 = vmatprep.subr.mxu0 %v2123_v1 }
 0x2b3   :  { %1851 = vmatpush3.msra.mxu0 %v2197_v8 }
 0x2b4   :  { %1852 = vmatprep.subr.mxu0 %v2123_v1 }
 0x2b5   :  { %1853 = vmatpush3.msra.mxu0 %v2216_v16 }
 0x2b6   :  { %1854 = vmatprep.subr.mxu0 %v2123_v1 }
 0x2b7   :  { %1855 = vmatpush3.msra.mxu0 %v2235_v24 }
 0x2b8   :  { %1870 = vmatprep.subr.mxu0 %v2123_v1 }
 0x370   :  { %v520_v54 = vpop.f32.mrf.mxu0 }
 0x371   :  { %v525_v55 = vrot.slane %v520_v54, 2 }
 0x372   :  { %v1836_v56 = vpop.f32.mrf.mxu0 }
 0x373   :  { %v527_v57 = vadd.f32 %v525_v55, %v205_v37 }
 0x375   :  { %2006 = vtanh.f32 %v527_v57 }
 0x382   :  { %v2007_v58 = vpop.eup %2006 }
 0x383   :  { %v530_v59 = vrot.slane %v2007_v58, 6  ;;  %v846_v60 = vsel %vm845_vm5, %v844_v53, %v2007_v58 }
 0x385   :  { %1846 = vmatmul.mubr.msk.f32.vlgmr.msra.gmra.mxu1 %vm217_vm2, %v530_v59 }
 0x386   :  { %1860 = vmatpush3.msra.mxu1 %v2192_v6  ;;  %1867 = vmatprep.mubr.msk.f32.mxu1 %vm2125_vm0, %v2123_v1 }
 0x387   :  { %1861 = vmatprep.subr.mxu1 %v2123_v1 }
 0x388   :  { %1862 = vmatpush3.msra.mxu1 %v2197_v8 }
 0x389   :  { %1863 = vmatprep.subr.mxu1 %v2123_v1 }
 0x38a   :  { %1864 = vmatpush3.msra.mxu1 %v2216_v16 }
 0x38b   :  { %1865 = vmatprep.subr.mxu1 %v2123_v1 }
 0x38c   :  { %1866 = vmatpush3.msra.mxu1 %v2235_v24 }
 0x445   :  { %v599_v61 = vpop.f32.mrf.mxu1 }
 0x446   :  { %v603_v62 = vadd.f32 %v599_v61, %v2266_v35 }
 0x447   :  { %v1847_v63 = vpop.f32.mrf.mxu1 }
 0x448   :  { %2008 = vtanh.f32 %v603_v62 }
 0x455   :  { %v2009_v0 = vpop.eup %2008 }
 0x456   :  { %1857 = vmatmul.mubr.msk.f32.vlgmr.msra.gmra.mxu0 %vm217_vm2, %v2009_v0 }
 0x457   :  { %1871 = vmatpush3.msra.mxu0 %v2192_v6  ;;  %1878 = vmatprep.mubr.msk.f32.mxu0 %vm2125_vm0, %v2123_v1 }
 0x458   :  { %1872 = vmatprep.subr.mxu0 %v2123_v1 }
 0x459   :  { %1873 = vmatpush3.msra.mxu0 %v2197_v8 }
 0x45a   :  { %1874 = vmatprep.subr.mxu0 %v2123_v1 }
 0x45b   :  { %1875 = vmatpush3.msra.mxu0 %v2216_v16  ;;  %v853_v16 = vld [vmem:[#allocation5 + $0x18] sm:$0xff] }
 0x45c   :  { %1876 = vmatprep.subr.mxu0 %v2123_v1  ;;  %1881 = vmatprep.subr.mxu1 %v853_v16 }
 0x45d   :  { %1877 = vmatpush3.msra.mxu0 %v2235_v24 }
 0x45e   :  { %1892 = vmatprep.subr.mxu0 %v2123_v1 }
 0x516   :  { %v674_v2 = vpop.f32.mrf.mxu0 }
 0x517   :  { %v679_v3 = vrot.slane %v674_v2, 6 }
 0x518   :  { %v1858_v4 = vpop.f32.mrf.mxu0 }
 0x519   :  { %v681_v5 = vadd.f32 %v679_v3, %v2266_v35 }
 0x51b   :  { %2010 = vtanh.f32 %v681_v5 }
 0x528   :  { %v2011_v6 = vpop.eup %2010 }
 0x529   :  { %v684_v7 = vrot.slane %v2011_v6, 2  ;;  %v847_v13 = vsel %vm841_vm3, %v2009_v0, %v2011_v6 }
 0x52b   :  { %1868 = vmatmul.mubr.msk.f32.vlgmr.msra.gmra.mxu1 %vm217_vm2, %v684_v7 }
 0x52c   :  { %1889 = vmatprep.mubr.msk.f32.mxu1 %vm217_vm2, %v846_v60  ;;  %1882 = vmatpush3.msra.mxu1 %v853_v16 }
 0x52d   :  { %1883 = vmatprep.subr.mxu1 %v852_v17 }
 0x52e   :  { %1884 = vmatpush3.msra.mxu1 %v852_v17 }
 0x52f   :  { %1885 = vmatprep.subr.mxu1 %v851_v20 }
 0x530   :  { %1886 = vmatpush3.msra.mxu1 %v851_v20  ;;  %v1689_v20 = vld [vmem:[%s2473_s8] ss:$0 sm:$0xff] }
 0x531   :  { %1887 = vmatprep.subr.mxu1 %v850_v22 }
 0x532   :  { %1888 = vmatpush3.msra.mxu1 %v850_v22 }
 0x533   :  { %1903 = vmatprep.subr.mxu1 %v2123_v1 }
 0x5eb   :  { %v753_v8 = vpop.f32.mrf.mxu1 }
 0x5ec   :  { %v758_v9 = vrot.slane %v753_v8, 4 }
 0x5ed   :  { %v1869_v10 = vpop.f32.mrf.mxu1 }
 0x5ee   :  { %v760_v11 = vadd.f32 %v758_v9, %v2266_v35  ;;  %v1569_v10 = vld [vmem:[%s2472_s7 + $0x18] sm:$0xff] }
 0x5f0   :  { %2012 = vtanh.f32 %v760_v11  ;;  %v1568_v11 = vld [vmem:[%s2472_s7 + $0x10] sm:$0xff] }
 0x5fd   :  { %v2013_v12 = vpop.eup %2012 }
 0x5fe   :  { %v763_v14 = vrot.slane %v2013_v12, 4  ;;  %v848_v15 = vsel %vm843_vm4, %v847_v13, %v2013_v12  ;;  %v1567_v12 = vld [vmem:[%s2472_s7 + $0x8] sm:$0xff]  ;;  %v1566_v13 = vld [vmem:[%s2472_s7] sm:$0xff]  ;;  %s2092_s7 = scalar_lea.vmem %s1660_s13, 32 }
 0x5ff   :  { %p2093_p1 = scmp.ne.s32.totalorder %s1660_s13, %s2092_s7  ;;  %p2098_p3 = scmp.lt.s32.totalorder %s2092_s7, %s2092_s7 }
 0x600   :  { %1879 = vmatmul.mubr.msk.f32.vlgmr.msra.gmra.mxu0 %vm217_vm2, %v763_v14 }
 0x601   :  { %1900 = vmatprep.mubr.msk.f32.mxu0 %vm2125_vm0, %v2123_v1  ;;  %1893 = vmatpush3.msra.mxu0 %v2335_v18  ;;  %p2099_p4 = por %p2098_p3, %p2097_p2 }
 0x602   :  { %1894 = vmatprep.subr.mxu0 %v2123_v1 }
 0x603   :  { %1895 = vmatpush3.msra.mxu0 %v2338_v19  ;;  %p2100_p5 = pnand %p2099_p4, %p2093_p1 }
 0x604   :  { %1896 = vmatprep.subr.mxu0 %v2123_v1 }
 0x605   :  { %1897 = vmatpush3.msra.mxu0 %v2341_v21 }
 0x606   :  { %1898 = vmatprep.subr.mxu0 %v2123_v1 }
 0x607   :  { %1899 = vmatpush3.msra.mxu0 %v2348_v23 }
 0x608   :  { %1901 = vmatmul.mubr.f32.vlgmr.msra.gmra.mxu0 %v2123_v1  ;;  %1914 = vmatprep.subr.mxu0 %v2123_v1 }
 0x609   :  { %1915 = vmatpush3.msra.mxu0 %v2335_v18  ;;  %1922 = vmatprep.mubr.msk.f32.mxu0 %vm2125_vm0, %v2123_v1 }
 0x60a   :  { %1916 = vmatprep.subr.mxu0 %v2123_v1 }
 0x60b   :  { %1917 = vmatpush3.msra.mxu0 %v2338_v19 }
 0x60c   :  { %1918 = vmatprep.subr.mxu0 %v2123_v1 }
 0x60d   :  { %1919 = vmatpush3.msra.mxu0 %v2341_v21 }
 0x60e   :  { %1920 = vmatprep.subr.mxu0 %v2123_v1 }
 0x60f   :  { %1921 = vmatpush3.msra.mxu0 %v2348_v23 }
 0x610   :  { %1936 = vmatprep.subr.mxu0 %v2123_v1 }
 0x6c0   :  { %v832_v24 = vpop.f32.mrf.mxu0 }
 0x6c1   :  { %v837_v25 = vrot.slane %v832_v24, 2 }
 0x6c2   :  { %v1880_v26 = vpop.f32.mrf.mxu0 }
 0x6c3   :  { %v839_v27 = vadd.f32 %v837_v25, %v2266_v35 }
 0x6c5   :  { %2014 = vtanh.f32 %v839_v27 }
 0x6c8   :  { %v1012_v30 = vpop.f32.mrf.mxu0 }
 0x6ca   :  { %v1902_v31 = vpop.f32.mrf.mxu0 }
 0x6d2   :  { %v2015_v28 = vpop.eup %2014 }
 0x6d3   :  { %v849_v29 = vsel %vm845_vm5, %v848_v15, %v2015_v28 }
 0x6d4   :  { %1890 = vmatmul.mubr.msk.f32.vlgmr.msra.gmra.mxu1 %vm217_vm2, %v849_v29 }
 0x6d5   :  { %1904 = vmatpush3.msra.mxu1 %v2335_v18  ;;  %1911 = vmatprep.mubr.msk.f32.mxu1 %vm2125_vm0, %v2123_v1 }
 0x6d6   :  { %1905 = vmatprep.subr.mxu1 %v2123_v1 }
 0x6d7   :  { %1906 = vmatpush3.msra.mxu1 %v2338_v19 }
 0x6d8   :  { %1907 = vmatprep.subr.mxu1 %v2123_v1 }
 0x6d9   :  { %1908 = vmatpush3.msra.mxu1 %v2341_v21 }
 0x6da   :  { %1909 = vmatprep.subr.mxu1 %v2123_v1 }
 0x6db   :  { %1910 = vmatpush3.msra.mxu1 %v2348_v23 }
 0x6dc   :  { %1925 = vmatprep.subr.mxu1 %v2123_v1 }
 0x794   :  { %v1891_v33 = vpop.f32.mrf.mxu1 }
 0x795   :  { %v2379_v34 = vadd.f32 %v1891_v33, %v1679_v32 }
 0x796   :  { %v933_v35 = vpop.f32.mrf.mxu1 }
 0x797   :  { %v934_v36 = vadd.f32 %v1679_v32, %v933_v35 }
 0x799   :  { %v1016_v37 = vadd.f32 %v1012_v30, %v934_v36 }
 0x79b   :  { %2016 = vtanh.f32 %v1016_v37 }
 0x7a8   :  { %v2017_v38 = vpop.eup %2016 }
 0x7a9   :  { %1912 = vmatmul.mubr.msk.f32.vlgmr.msra.gmra.mxu1 %vm217_vm2, %v2017_v38 }
 0x7aa   :  { %1926 = vmatpush3.msra.mxu1 %v2335_v18  ;;  %1933 = vmatprep.mubr.msk.f32.mxu1 %vm2125_vm0, %v2123_v1 }
 0x7ab   :  { %1927 = vmatprep.subr.mxu1 %v2123_v1 }
 0x7ac   :  { %1928 = vmatpush3.msra.mxu1 %v2338_v19 }
 0x7ad   :  { %1929 = vmatprep.subr.mxu1 %v2123_v1 }
 0x7ae   :  { %1930 = vmatpush3.msra.mxu1 %v2341_v21 }
 0x7af   :  { %1931 = vmatprep.subr.mxu1 %v2123_v1 }
 0x7b0   :  { %1932 = vmatpush3.msra.mxu1 %v2348_v23 }
 0x7b1   :  { %1947 = vmatprep.subr.mxu1 %v2123_v1 }
 0x869   :  { %v1087_v39 = vpop.f32.mrf.mxu1 }
 0x86a   :  { %v1092_v40 = vrot.slane %v1087_v39, 6 }
 0x86b   :  { %v1913_v41 = vpop.f32.mrf.mxu1 }
 0x86c   :  { %v1094_v42 = vadd.f32 %v1092_v40, %v934_v36 }
 0x86e   :  { %2018 = vtanh.f32 %v1094_v42 }
 0x87b   :  { %v2019_v43 = vpop.eup %2018 }
 0x87c   :  { %v1097_v44 = vrot.slane %v2019_v43, 2 }
 0x87e   :  { %1923 = vmatmul.mubr.msk.f32.vlgmr.msra.gmra.mxu0 %vm217_vm2, %v1097_v44 }
 0x87f   :  { %1937 = vmatpush3.msra.mxu0 %v2335_v18  ;;  %1944 = vmatprep.mubr.msk.f32.mxu0 %vm2125_vm0, %v2123_v1 }
 0x880   :  { %1938 = vmatprep.subr.mxu0 %v2123_v1 }
 0x881   :  { %1939 = vmatpush3.msra.mxu0 %v2338_v19 }
 0x882   :  { %1940 = vmatprep.subr.mxu0 %v2123_v1 }
 0x883   :  { %1941 = vmatpush3.msra.mxu0 %v2341_v21 }
 0x884   :  { %1942 = vmatprep.subr.mxu0 %v2123_v1 }
 0x885   :  { %1943 = vmatpush3.msra.mxu0 %v2348_v23 }
 0x886   :  { %1958 = vmatprep.subr.mxu0 %v2123_v1 }
 0x93e   :  { %v1166_v45 = vpop.f32.mrf.mxu0 }
 0x93f   :  { %v1171_v46 = vrot.slane %v1166_v45, 4 }
 0x940   :  { %v1924_v47 = vpop.f32.mrf.mxu0 }
 0x941   :  { %v1173_v48 = vadd.f32 %v1171_v46, %v934_v36 }
 0x943   :  { %2020 = vtanh.f32 %v1173_v48 }
 0x950   :  { %v2021_v49 = vpop.eup %2020 }
 0x951   :  { %v1176_v50 = vrot.slane %v2021_v49, 4 }
 0x953   :  { %1934 = vmatmul.mubr.msk.f32.vlgmr.msra.gmra.mxu1 %vm217_vm2, %v1176_v50 }
 0x954   :  { %1948 = vmatpush3.msra.mxu1 %v2335_v18  ;;  %1955 = vmatprep.mubr.msk.f32.mxu1 %vm2125_vm0, %v2123_v1 }
 0x955   :  { %1949 = vmatprep.subr.mxu1 %v2123_v1 }
 0x956   :  { %1950 = vmatpush3.msra.mxu1 %v2338_v19 }
 0x957   :  { %1951 = vmatprep.subr.mxu1 %v2123_v1 }
 0x958   :  { %1952 = vmatpush3.msra.mxu1 %v2341_v21 }
 0x959   :  { %1953 = vmatprep.subr.mxu1 %v2123_v1 }
 0x95a   :  { %1954 = vmatpush3.msra.mxu1 %v2348_v23 }
 0x95b   :  { %1969 = vmatprep.subr.mxu1 %v2123_v1 }
 0xa13   :  { %v1245_v51 = vpop.f32.mrf.mxu1 }
 0xa14   :  { %v1250_v52 = vrot.slane %v1245_v51, 2 }
 0xa15   :  { %v1935_v53 = vpop.f32.mrf.mxu1 }
 0xa16   :  { %v1252_v54 = vadd.f32 %v1250_v52, %v934_v36 }
 0xa18   :  { %2022 = vtanh.f32 %v1252_v54 }
 0xa25   :  { %v2023_v55 = vpop.eup %2022 }
 0xa26   :  { %v1255_v56 = vrot.slane %v2023_v55, 6 }
 0xa28   :  { %1945 = vmatmul.mubr.msk.f32.vlgmr.msra.gmra.mxu0 %vm217_vm2, %v1255_v56 }
 0xa29   :  { %1959 = vmatpush3.msra.mxu0 %v2335_v18  ;;  %1966 = vmatprep.mubr.msk.f32.mxu0 %vm2125_vm0, %v2123_v1 }
 0xa2a   :  { %1960 = vmatprep.subr.mxu0 %v2123_v1 }
 0xa2b   :  { %1961 = vmatpush3.msra.mxu0 %v2338_v19 }
 0xa2c   :  { %1962 = vmatprep.subr.mxu0 %v2123_v1 }
 0xa2d   :  { %1963 = vmatpush3.msra.mxu0 %v2341_v21 }
 0xa2e   :  { %1964 = vmatprep.subr.mxu0 %v2123_v1 }
 0xa2f   :  { %1965 = vmatpush3.msra.mxu0 %v2348_v23 }
 0xa30   :  { %1980 = vmatprep.subr.mxu0 %v2123_v1 }
 0xae8   :  { %v1324_v57 = vpop.f32.mrf.mxu0 }
 0xae9   :  { %v1328_v58 = vadd.f32 %v1324_v57, %v2379_v34 }
 0xaea   :  { %v1946_v59 = vpop.f32.mrf.mxu0 }
 0xaeb   :  { %2024 = vtanh.f32 %v1328_v58 }
 0xaf8   :  { %v2025_v60 = vpop.eup %2024 }
 0xaf9   :  { %1956 = vmatmul.mubr.msk.f32.vlgmr.msra.gmra.mxu1 %vm217_vm2, %v2025_v60 }
 0xafa   :  { %1970 = vmatpush3.msra.mxu1 %v2335_v18  ;;  %1977 = vmatprep.mubr.msk.f32.mxu1 %vm2125_vm0, %v2123_v1 }
 0xafb   :  { %1971 = vmatprep.subr.mxu1 %v2123_v1 }
 0xafc   :  { %1972 = vmatpush3.msra.mxu1 %v2338_v19 }
 0xafd   :  { %1973 = vmatprep.subr.mxu1 %v2123_v1 }
 0xafe   :  { %1974 = vmatpush3.msra.mxu1 %v2341_v21 }
 0xaff   :  { %1975 = vmatprep.subr.mxu1 %v2123_v1 }
 0xb00   :  { %1976 = vmatpush3.msra.mxu1 %v2348_v23 }
 0xbb9   :  { %v1399_v61 = vpop.f32.mrf.mxu1 }
 0xbba   :  { %v1404_v62 = vrot.slane %v1399_v61, 6 }
 0xbbb   :  { %v1957_v63 = vpop.f32.mrf.mxu1 }
 0xbbc   :  { %v1406_v0 = vadd.f32 %v1404_v62, %v2379_v34 }
 0xbbe   :  { %2026 = vtanh.f32 %v1406_v0 }
 0xbcb   :  { %v2027_v2 = vpop.eup %2026 }
 0xbcc   :  { %v1409_v3 = vrot.slane %v2027_v2, 2 }
 0xbce   :  { %1967 = vmatmul.mubr.msk.f32.vlgmr.msra.gmra.mxu0 %vm217_vm2, %v1409_v3 }
 0xbcf   :  { %1988 = vmatprep.mubr.msk.f32.mxu0 %vm2125_vm0, %v2123_v1  ;;  %1981 = vmatpush3.msra.mxu0 %v1569_v10 }
 0xbd0   :  { %1982 = vmatprep.subr.mxu0 %v2123_v1 }
 0xbd1   :  { %1983 = vmatpush3.msra.mxu0 %v1568_v11 }
 0xbd2   :  { %1984 = vmatprep.subr.mxu0 %v2123_v1 }
 0xbd3   :  { %1985 = vmatpush3.msra.mxu0 %v1567_v12 }
 0xbd4   :  { %1986 = vmatprep.subr.mxu0 %v2123_v1 }
 0xbd5   :  { %1987 = vmatpush3.msra.mxu0 %v1566_v13 }
 0xc8e   :  { %v1478_v4 = vpop.f32.mrf.mxu0 }
 0xc8f   :  { %v1483_v5 = vrot.slane %v1478_v4, 4 }
 0xc90   :  { %v1968_v6 = vpop.f32.mrf.mxu0 }
 0xc91   :  { %v1485_v7 = vadd.f32 %v1483_v5, %v2379_v34 }
 0xc93   :  { %2028 = vtanh.f32 %v1485_v7 }
 0xca0   :  { %v2029_v8 = vpop.eup %2028 }
 0xca1   :  { %v1488_v9 = vrot.slane %v2029_v8, 4 }
 0xca3   :  { %1978 = vmatmul.mubr.msk.f32.vlgmr.msra.gmra.mxu1 %vm217_vm2, %v1488_v9 }
 0xd63   :  { %v1557_v14 = vpop.f32.mrf.mxu1 }
 0xd64   :  { %v1562_v15 = vrot.slane %v1557_v14, 2 }
 0xd65   :  { %v1979_v16 = vpop.f32.mrf.mxu1 }
 0xd66   :  { %v1564_v17 = vadd.f32 %v1562_v15, %v2379_v34 }
 0xd68   :  { %2030 = vtanh.f32 %v1564_v17 }
 0xd75   :  { %v2031_v18 = vpop.eup %2030 }
 0xd76   :  { %v1578_v19 = vrot.slane %v2031_v18, 6 }
 0xd78   :  { %1989 = vmatmul.mubr.msk.f32.vlgmr.msra.gmra.mxu0 %vm217_vm2, %v1578_v19 }
 0xe38   :  { %v1647_v1 = vpop.f32.mrf.mxu0 }
 0xe39   :  { %v1648_v21 = vadd.f32 %v1689_v20, %v1647_v1 }
 0xe3a   :  { %v1990_v22 = vpop.f32.mrf.mxu0 }
 0xe3b   :  { %1652 = vst.msk [vmem:[#allocation8] sm:$0x3] %vm1651_vm6, %v1648_v21 }
 0xe3c   :  { %2103 = shalt.err (!%p2100_p5)
}
 0xe3d   :  { %1662 = dma.vmem_to_hbm [thread:$0]  %s1660_s13, 32, %s2474_s9, [#allocation4]  }
 0xe3e   :  { %2116 = dma.done.wait [#allocation4], 32  }
 0xe3f   :  { %2117 = vsyncadd [#allocation4], 4294967264 }
 0xe40   :  { %1666 = vsyncpa [#allocation3], 1 }
 0xe41   :  { %1667 = vsyncpa [#allocation6], 1 }
 0xe42   :  { %1668 = vsyncpa [#allocation4], 1 }

</bundles_post_ra>
